<compile_context>
chip_gen: v6e
topology: v6e:2x2x1
jax: 0.10.0
libtpu: 0.0.40
codegen_flags: <defaults>
</compile_context>

<pallas_src>
import jax
import jax.numpy as jnp
from jax.experimental import pallas as pl
from jax.experimental.pallas import tpu as pltpu

_LANES = 128
_SUBLANES = 8
_NEG_BIG = -1e30  # bias for padded logit columns -> exp() underflows to 0


def _round_up(n, m):
    return ((n + m - 1) // m) * m


# ----------------------------------------------------------------------------
# Kernel: one grid step == one RNN timestep.
# ----------------------------------------------------------------------------
def rnn_seq_kernel(x_ref, h0_ref, wcat_ref, bcat_ref, wo_ref, bo_ref,
                   out_ref, hfin_ref, h_scratch):
    t = pl.program_id(0)

    # Load the incoming hidden state once, at the first timestep.
    @pl.when(t == 0)
    def _():
        h_scratch[...] = h0_ref[...]

    x = x_ref[0]                     # (B_pad, IN)
    h = h_scratch[...]               # (B_pad, H)

    # Fused i2h + h2h: single MXU pass over the concatenated operand.
    xh = jnp.concatenate([x, h], axis=-1)                       # (B_pad, IN+H)
    hidden = jnp.tanh(
        jnp.dot(xh, wcat_ref[...], preferred_element_type=jnp.float32)
        + bcat_ref[...])

    # h2o + numerically stable log_softmax over the feature axis.
    # Padded logit columns carry a -1e30 bias, so exp(z) there is exactly 0 and
    # the real columns match the unpadded log_softmax bit-for-bit.
    logits = (jnp.dot(hidden, wo_ref[...], preferred_element_type=jnp.float32)
              + bo_ref[...])
    m = jnp.max(logits, axis=-1, keepdims=True)
    z = logits - m
    lse = jnp.log(jnp.sum(jnp.exp(z), axis=-1, keepdims=True))

    out_ref[0] = (z - lse).astype(out_ref.dtype)

    # Carry the recurrent state. The final-hidden output block index is
    # constant across the grid, so it stays resident in VMEM and is written
    # back to HBM only once at the end.
    h_scratch[...] = hidden
    hfin_ref[...] = hidden.astype(hfin_ref.dtype)


# ----------------------------------------------------------------------------
# Parameter preparation (done ONCE, outside the per-step / per-call path).
# ----------------------------------------------------------------------------
def prepare_params(params):
    """Pack PyTorch-layout params for the kernel.

    Returns (w_cat, b_cat, wo_t, bo_r, output_size) where
      w_cat : (IN+H, H)    = [Wi.T ; Wh.T]
      b_cat : (1, H)       = bi + bh
      wo_t  : (H, O_pad)   = Wo.T zero-padded on the lane axis to 128
      bo_r  : (1, O_pad)   = bo, padded columns set to -1e30
    """
    wi, bi, wh, bh, wo, bo = params
    hidden_size = wh.shape[0]
    output_size = wo.shape[0]
    out_pad = _round_up(max(output_size, _LANES), _LANES)

    w_cat = jnp.concatenate([wi.T, wh.T], axis=0).astype(jnp.float32)
    b_cat = (bi + bh).reshape(1, -1).astype(jnp.float32)

    wo_t = jnp.zeros((hidden_size, out_pad), jnp.float32)
    wo_t = wo_t.at[:, :output_size].set(wo.T.astype(jnp.float32))
    bo_r = jnp.full((1, out_pad), _NEG_BIG, jnp.float32)
    bo_r = bo_r.at[:, :output_size].set(bo.astype(jnp.float32))
    return (w_cat, b_cat, wo_t, bo_r, output_size)


# ----------------------------------------------------------------------------
# Wrappers
# ----------------------------------------------------------------------------
def rnn_forward_seq(xs, h0, prepared):
    """Run the RNN over a whole sequence in one pallas_call.

    xs: (T, B, input_size), h0: (B, hidden_size)
    Returns (log_probs (T, B, output_size), final_hidden (B, hidden_size)).
    """
    w_cat, b_cat, wo_t, bo_r, output_size = prepared
    T, B, IN = xs.shape
    H = h0.shape[1]
    OUT_PAD = wo_t.shape[1]

    # Pad batch to a sublane multiple (padded rows are zeros; results sliced off).
    B_pad = _round_up(max(B, _SUBLANES), _SUBLANES)
    if B_pad != B:
        xs = jnp.pad(xs, ((0, 0), (0, B_pad - B), (0, 0)))
        h0 = jnp.pad(h0, ((0, B_pad - B), (0, 0)))
    xs = xs.astype(jnp.float32)
    h0 = h0.astype(jnp.float32)

    const2 = lambda t: (0, 0)

    log_probs_p, h_final_p = pl.pallas_call(
        rnn_seq_kernel,
        out_shape=(
            jax.ShapeDtypeStruct((T, B_pad, OUT_PAD), jnp.float32),
            jax.ShapeDtypeStruct((B_pad, H), jnp.float32),
        ),
        grid=(T,),
        in_specs=[
            # x: one timestep per grid step, auto double-buffered pipeline.
            pl.BlockSpec((1, B_pad, IN), lambda t: (t, 0, 0)),
            # initial hidden + weights/biases: constant block -> VMEM-resident.
            pl.BlockSpec((B_pad, H), const2),
            pl.BlockSpec((IN + H, H), const2),
            pl.BlockSpec((1, H), const2),
            pl.BlockSpec((H, OUT_PAD), const2),
            pl.BlockSpec((1, OUT_PAD), const2),
        ],
        out_specs=(
            pl.BlockSpec((1, B_pad, OUT_PAD), lambda t: (t, 0, 0)),
            pl.BlockSpec((B_pad, H), const2),
        ),
        scratch_shapes=[pltpu.VMEM((B_pad, H), jnp.float32)],
        compiler_params=pltpu.CompilerParams(
            # Time axis is a true recurrence -> "arbitrary". (A batch/sequence
            # grid axis could be added and marked "parallel" for v7x megacore.)
            dimension_semantics=("arbitrary",),
        ),
    )(xs, h0, w_cat, b_cat, wo_t, bo_r)

    log_probs = log_probs_p[:, :B, :output_size]
    final_hidden = jax.lax.stop_gradient(h_final_p[:B])  # mirrors .detach()
    return log_probs, final_hidden


def rnn_forward(x, h, prepared):
    """Single-step forward matching the PyTorch module: (log_probs, hidden)."""
    log_probs, h_new = rnn_forward_seq(x[None], h, prepared)
    return log_probs[0], h_new


# ----------------------------------------------------------------------------
# Init + pure-JAX reference
# ----------------------------------------------------------------------------
def init_params(key, input_size, hidden_size, output_size):
    """PyTorch-style uniform(-1/sqrt(fan_in), 1/sqrt(fan_in)) init."""
    ks = jax.random.split(key, 6)

    def lin(kw, kb, out_f, in_f):
        bound = 1.0 / jnp.sqrt(jnp.float32(in_f))
        w = jax.random.uniform(kw, (out_f, in_f), jnp.float32, -bound, bound)
        b = jax.random.uniform(kb, (out_f,), jnp.float32, -bound, bound)
        return w, b

    wi, bi = lin(ks[0], ks[1], hidden_size, input_size)
    wh, bh = lin(ks[2], ks[3], hidden_size, hidden_size)
    wo, bo = lin(ks[4], ks[5], output_size, hidden_size)
    return (wi, bi, wh, bh, wo, bo)


def rnn_forward_seq_ref(xs, h, params):
    """Pure-JAX reference: loop of the PyTorch module's forward()."""
    wi, bi, wh, bh, wo, bo = params
    outs = []
    for t in range(xs.shape[0]):
        h = jnp.tanh(xs[t] @ wi.T + bi + h @ wh.T + bh)
        logits = h @ wo.T + bo
        outs.append(jax.nn.log_softmax(logits, axis=1))
    return jnp.stack(outs), h


if __name__ == "__main__":
    input_size, hidden_size, output_size = 16, 32, 16
    batch, seq = 2, 8

    key = jax.random.PRNGKey(0)
    k_params, k_x = jax.random.split(key)
    params = init_params(k_params, input_size, hidden_size, output_size)
    prepared = prepare_params(params)            # hoisted: done once, not per step

    xs = jax.random.normal(k_x, (seq, batch, input_size), jnp.float32)
    h0 = jnp.zeros((batch, hidden_size), jnp.float32)   # init_hidden

    # Whole sequence in one pallas_call.
    log_probs, h_final = rnn_forward_seq(xs, h0, prepared)
    jax.block_until_ready((log_probs, h_final))

    # Verify against the plain-JAX reference loop.
    ref_lp, ref_h = rnn_forward_seq_ref(xs, h0, params)
    assert log_probs.shape == (seq, batch, output_size)
    assert h_final.shape == (batch, hidden_size)
    assert jnp.allclose(log_probs, ref_lp, atol=1e-4, rtol=1e-4)
    assert jnp.allclose(h_final, ref_h, atol=1e-4, rtol=1e-4)

    # Single-step API (matches the module's forward signature) also checks out.
    lp1, h1 = rnn_forward(xs[0], h0, prepared)
    assert jnp.allclose(lp1, ref_lp[0], atol=1e-4, rtol=1e-4)

    print("KERNEL_OK")
</pallas_src>

<mosaic_0001>
module attributes {stable_mosaic.version = 11 : i64} {
  func.func @rnn_seq_kernel(%arg0: i32, %arg1: memref<1x8x16xf32, #tpu.memory_space<vmem>>, %arg2: memref<8x32xf32, #tpu.memory_space<vmem>>, %arg3: memref<48x32xf32, #tpu.memory_space<vmem>>, %arg4: memref<1x32xf32, #tpu.memory_space<vmem>>, %arg5: memref<32x128xf32, #tpu.memory_space<vmem>>, %arg6: memref<1x128xf32, #tpu.memory_space<vmem>>, %arg7: memref<1x8x128xf32, #tpu.memory_space<vmem>>, %arg8: memref<8x32xf32, #tpu.memory_space<vmem>>, %arg9: memref<8x32xf32, #tpu.memory_space<vmem>>) attributes {dimension_semantics = [#tpu.dimension_semantics<arbitrary>], iteration_bounds = array<i64: 8>, scalar_prefetch = 0 : i64, scratch_operands = 1 : i64, tpu.core_type = #tpu.core_type<tc>, window_params = [{transform_indices = @transform_0, window_bounds = array<i64: 1, 8, 16>}, {pipeline_mode = #tpu.pipeline_mode<synchronous>, transform_indices = @transform_1, window_bounds = array<i64: 8, 32>}, {pipeline_mode = #tpu.pipeline_mode<synchronous>, transform_indices = @transform_2, window_bounds = array<i64: 48, 32>}, {pipeline_mode = #tpu.pipeline_mode<synchronous>, transform_indices = @transform_3, window_bounds = array<i64: 1, 32>}, {pipeline_mode = #tpu.pipeline_mode<synchronous>, transform_indices = @transform_4, window_bounds = array<i64: 32, 128>}, {pipeline_mode = #tpu.pipeline_mode<synchronous>, transform_indices = @transform_5, window_bounds = array<i64: 1, 128>}, {transform_indices = @transform_6, window_bounds = array<i64: 1, 8, 128>}, {pipeline_mode = #tpu.pipeline_mode<synchronous>, transform_indices = @transform_7, window_bounds = array<i64: 8, 32>}]} {
    %c0_i32 = arith.constant 0 : i32
    %0 = arith.cmpi eq, %arg0, %c0_i32 : i32
    %1 = arith.extui %0 : i1 to i32
    %c0_i32_0 = arith.constant 0 : i32
    %2 = arith.cmpi ne, %1, %c0_i32_0 : i32
    scf.if %2 {
      %c0_23 = arith.constant 0 : index
      %c0_24 = arith.constant 0 : index
      %33 = vector.load %arg2[%c0_23, %c0_24] : memref<8x32xf32, #tpu.memory_space<vmem>>, vector<8x32xf32>
      %c0_25 = arith.constant 0 : index
      %c0_26 = arith.constant 0 : index
      %34 = vector.load %arg9[%c0_25, %c0_26] : memref<8x32xf32, #tpu.memory_space<vmem>>, vector<8x32xf32>
      tpu.vector_store %arg9[%c0_25, %c0_26], %33 {strides = array<i32>} : memref<8x32xf32, #tpu.memory_space<vmem>>, vector<8x32xf32>,
    } else {
    }
    %c0 = arith.constant 0 : index
    %c0_1 = arith.constant 0 : index
    %c0_2 = arith.constant 0 : index
    %3 = vector.load %arg1[%c0, %c0_1, %c0_2] : memref<1x8x16xf32, #tpu.memory_space<vmem>>, vector<1x8x16xf32>
    %4 = vector.shape_cast %3 : vector<1x8x16xf32> to vector<8x16xf32>
    %c0_3 = arith.constant 0 : index
    %c0_4 = arith.constant 0 : index
    %5 = vector.load %arg9[%c0_3, %c0_4] : memref<8x32xf32, #tpu.memory_space<vmem>>, vector<8x32xf32>
    %6 = tpu.concatenate %4, %5 in 1 : vector<8x16xf32>, vector<8x32xf32> -> vector<8x48xf32>
    %c0_5 = arith.constant 0 : index
    %c0_6 = arith.constant 0 : index
    %7 = vector.load %arg3[%c0_5, %c0_6] : memref<48x32xf32, #tpu.memory_space<vmem>>, vector<48x32xf32>
    %cst = arith.constant dense<0.000000e+00> : vector<8x32xf32>
    %8 = tpu.matmul %6, %7, %cst {dimension_numbers = #tpu.dot_dimension_numbers<[1], [0], [0], [1], [0, 0, 1, 1], [], []>} : vector<8x48xf32>, vector<48x32xf32>, vector<8x32xf32> -> vector<8x32xf32>
    %c0_7 = arith.constant 0 : index
    %c0_8 = arith.constant 0 : index
    %9 = vector.load %arg4[%c0_7, %c0_8] : memref<1x32xf32, #tpu.memory_space<vmem>>, vector<1x32xf32>
    %10 = vector.broadcast %9 : vector<1x32xf32> to vector<8x32xf32>
    %11 = arith.addf %8, %10 : vector<8x32xf32>
    %12 = math.tanh %11 : vector<8x32xf32>
    %c0_9 = arith.constant 0 : index
    %c0_10 = arith.constant 0 : index
    %13 = vector.load %arg5[%c0_9, %c0_10] : memref<32x128xf32, #tpu.memory_space<vmem>>, vector<32x128xf32>
    %cst_11 = arith.constant dense<0.000000e+00> : vector<8x128xf32>
    %14 = tpu.matmul %12, %13, %cst_11 {dimension_numbers = #tpu.dot_dimension_numbers<[1], [0], [0], [1], [0, 0, 1, 1], [], []>} : vector<8x32xf32>, vector<32x128xf32>, vector<8x128xf32> -> vector<8x128xf32>
    %c0_12 = arith.constant 0 : index
    %c0_13 = arith.constant 0 : index
    %15 = vector.load %arg6[%c0_12, %c0_13] : memref<1x128xf32, #tpu.memory_space<vmem>>, vector<1x128xf32>
    %16 = vector.broadcast %15 : vector<1x128xf32> to vector<8x128xf32>
    %17 = arith.addf %14, %16 : vector<8x128xf32>
    %cst_14 = arith.constant dense<0xFF800000> : vector<8xf32>
    %18 = vector.multi_reduction <maximumf>, %17, %cst_14 [1] : vector<8x128xf32> to vector<8xf32>
    %19 = vector.shape_cast %18 : vector<8xf32> to vector<8x1xf32>
    %20 = vector.broadcast %19 : vector<8x1xf32> to vector<8x128xf32>
    %21 = arith.subf %17, %20 : vector<8x128xf32>
    %22 = math.exp %21 : vector<8x128xf32>
    %cst_15 = arith.constant dense<0.000000e+00> : vector<8xf32>
    %23 = vector.multi_reduction <add>, %22, %cst_15 [1] : vector<8x128xf32> to vector<8xf32>
    %24 = vector.shape_cast %23 : vector<8xf32> to vector<8x1xf32>
    %25 = math.log %24 : vector<8x1xf32>
    %26 = vector.broadcast %25 : vector<8x1xf32> to vector<8x128xf32>
    %27 = arith.subf %21, %26 : vector<8x128xf32>
    %c0_16 = arith.constant 0 : index
    %c0_17 = arith.constant 0 : index
    %c0_18 = arith.constant 0 : index
    %28 = vector.load %arg7[%c0_16, %c0_17, %c0_18] : memref<1x8x128xf32, #tpu.memory_space<vmem>>, vector<1x8x128xf32>
    %29 = vector.shape_cast %28 : vector<1x8x128xf32> to vector<8x128xf32>
    %30 = vector.shape_cast %27 : vector<8x128xf32> to vector<1x8x128xf32>
    tpu.vector_store %arg7[%c0_16, %c0_17, %c0_18], %30 {strides = array<i32>} : memref<1x8x128xf32, #tpu.memory_space<vmem>>, vector<1x8x128xf32>,
    %c0_19 = arith.constant 0 : index
    %c0_20 = arith.constant 0 : index
    %31 = vector.load %arg9[%c0_19, %c0_20] : memref<8x32xf32, #tpu.memory_space<vmem>>, vector<8x32xf32>
    tpu.vector_store %arg9[%c0_19, %c0_20], %12 {strides = array<i32>} : memref<8x32xf32, #tpu.memory_space<vmem>>, vector<8x32xf32>,
    %c0_21 = arith.constant 0 : index
    %c0_22 = arith.constant 0 : index
    %32 = vector.load %arg8[%c0_21, %c0_22] : memref<8x32xf32, #tpu.memory_space<vmem>>, vector<8x32xf32>
    tpu.vector_store %arg8[%c0_21, %c0_22], %12 {strides = array<i32>} : memref<8x32xf32, #tpu.memory_space<vmem>>, vector<8x32xf32>,
    return
  }
  func.func @transform_0(%arg0: i32) -> (i32, i32, i32) {
    %c0_i32 = arith.constant 0 : i32
    %c0_i32_0 = arith.constant 0 : i32
    %c0_i32_1 = arith.constant 0 : i32
    return %arg0, %c0_i32, %c0_i32_0 : i32, i32, i32
  }
  func.func @transform_1(%arg0: i32) -> (i32, i32) {
    %c0_i32 = arith.constant 0 : i32
    %c0_i32_0 = arith.constant 0 : i32
    %c0_i32_1 = arith.constant 0 : i32
    return %c0_i32, %c0_i32_0 : i32, i32
  }
  func.func @transform_2(%arg0: i32) -> (i32, i32) {
    %c0_i32 = arith.constant 0 : i32
    %c0_i32_0 = arith.constant 0 : i32
    %c0_i32_1 = arith.constant 0 : i32
    return %c0_i32, %c0_i32_0 : i32, i32
  }
  func.func @transform_3(%arg0: i32) -> (i32, i32) {
    %c0_i32 = arith.constant 0 : i32
    %c0_i32_0 = arith.constant 0 : i32
    %c0_i32_1 = arith.constant 0 : i32
    return %c0_i32, %c0_i32_0 : i32, i32
  }
  func.func @transform_4(%arg0: i32) -> (i32, i32) {
    %c0_i32 = arith.constant 0 : i32
    %c0_i32_0 = arith.constant 0 : i32
    %c0_i32_1 = arith.constant 0 : i32
    return %c0_i32, %c0_i32_0 : i32, i32
  }
  func.func @transform_5(%arg0: i32) -> (i32, i32) {
    %c0_i32 = arith.constant 0 : i32
    %c0_i32_0 = arith.constant 0 : i32
    %c0_i32_1 = arith.constant 0 : i32
    return %c0_i32, %c0_i32_0 : i32, i32
  }
  func.func @transform_6(%arg0: i32) -> (i32, i32, i32) {
    %c0_i32 = arith.constant 0 : i32
    %c0_i32_0 = arith.constant 0 : i32
    %c0_i32_1 = arith.constant 0 : i32
    return %arg0, %c0_i32, %c0_i32_0 : i32, i32, i32
  }
  func.func @transform_7(%arg0: i32) -> (i32, i32) {
    %c0_i32 = arith.constant 0 : i32
    %c0_i32_0 = arith.constant 0 : i32
    %c0_i32_1 = arith.constant 0 : i32
    return %c0_i32, %c0_i32_0 : i32, i32
  }
}

</mosaic_0001>

<bundles_post_ra>
// kernel: tpu_custom_call.1
= control target key start
LH: loop header
LB: loop body
LE: loop exit
PB: predicated region body
PF: predicated region fallthrough
CT: control target
= control target key end

     0   :  { %13 = vsyncpa [#allocation4], 0  ;;  %s1051_s0 = inlined_call_operand.vmem [shape: f32[8,8,16], index: 0, kind: input, shape index: {}]   ;;  %s1052_s1 = inlined_call_operand.vmem [shape: f32[8,32], index: 1, kind: input, shape index: {}]   ;;  %s1053_s2 = inlined_call_operand.vmem [shape: f32[48,32], index: 2, kind: input, shape index: {}]   ;;  %s1054_s3 = inlined_call_operand.vmem [shape: f32[1,32], index: 3, kind: input, shape index: {}]   ;;  %s1055_s4 = inlined_call_operand.hbm [shape: f32[32,128], index: 4, kind: input, shape index: {}]   ;;  %s1056_s5 = inlined_call_operand.vmem [shape: f32[1,128], index: 5, kind: input, shape index: {}]   ;;  %s1057_s6 = inlined_call_operand.hbm [shape: f32[8,8,128], index: 6, kind: output, shape index: {0}]   ;;  %s1058_s7 = inlined_call_operand.hbm [shape: f32[8,32], index: 7, kind: output, shape index: {1}]  }
   0x1   :  { %14 = vsyncpa [#allocation5], 0 }
   0x2   :  { %16 = vsyncpa [#allocation5 + $0x1], 0 }
   0x3   :  { %17 = vsyncpa [#allocation8], 0  ;;  %s889_s24 = smov 0   ;;  %s891_s25 = smov 0  }
   0x4   :  { %s893_s26 = smov 0   ;;  %s895_s27 = smov 0  }
   0x5 LB: > { %s910_s28 = sadd.s32 4294967295, %s839_s27   ;;  %s596_s29 = sadd.s32 4294967294, %s839_s27   ;;  %s839_s27 = sphi %s895_s27, %s1072_s27   ;;  %s835_s26 = sphi %s893_s26, %s1071_s26   ;;  %s831_s25 = sphi %s891_s25, %s1070_s25   ;;  %s827_s24 = sphi %s889_s24, %s1069_s24  }
   0x6   : > { %s914_s30 = sadd.s32 1, %s839_s27   ;;  %s161_s8 = sadd.s32 1, %s835_s26 }
   0x7   : > { %s158_s9 = ssub.s32 %s839_s27, %s914_s30  ;;  %p171_p0 = scmp.ne.s32.totalorder %s835_s26, %s831_s25 }
   0x8   : > { %p159_p1 = scmp.eq.s32.totalorder %s158_s9, 0  ;;  %p1059_p2 = scmp.eq.s32.totalorder %s910_s28, 7 }
   0x9   : > { %p177_p3 = scmp.ne.s32.totalorder %s831_s25, %s827_s24  ;;  %p178_p4 = scmp.eq.s32.totalorder %s596_s29, 7 }
   0xa   : > { %s925_s10 = scalar_select %p159_p1, %s835_s26, %s161_s8  }
   0xb   : > { %p929_p5 = por %p1059_p2, %p171_p0  ;;  %p933_p6 = por %p178_p4, %p177_p3 }
   0xc   : > { %p597_p7 = scmp.ge.s32.totalorder %s839_s27, 1  ;;  %p206_p8 = scmp.lt.s32.totalorder %s839_s27, 9 }
   0xd   : > { %s1061_s12 = scalar_select %p933_p6, 1, 0 }
   0xe   : > { %p671_p10 = scmp.eq.s32.totalorder %s910_s28, 0  ;;  %p941_p11 = pnand %p597_p7, %p206_p8 }
   0xf   : > { %s841_s14 = smov [#allocation3]  }
  0x10   : > { %s227_s15 = sshll.u32 %s841_s14, 4  ;;  %p663_p12 = pneg %p941_p11  ;;  %s228_s15 = int_to_ptr.vmem [resolvable:$true] %s227_s15 }
  0x11   : > { %s732_s16 = scalar_lea.vmem %s228_s15, 512  ;;  %p740_p2 = scmp.lt.s32.totalorder %s228_s15, %s228_s15 }
  0x12   : > { %p664_p13 = pnand %p671_p10, %p663_p12  ;;  %p733_p1 = scmp.ne.s32.totalorder %s228_s15, %s732_s16 }
  0x13   : > { %p741_p9 = scmp.lt.s32.totalorder %s732_s16, %s732_s16 }
  0x14   : > { %p723_p0 = pneg %p664_p13 }
  0x15   : > { %p742_p6 = por %p741_p9, %p740_p2 }
  0x16   : > { %p735_p3 = pnand %p733_p1, %p723_p0 }
  0x18   : > { %p736_p4 = pneg %p735_p3 }
  0x1a   : > { %p743_p7 = pnand %p742_p6, %p736_p4 }
  0x1c   : > { %746 = shalt.err (!%p743_p7)
}
  0x1d   : > { %s842_s17 = smov 128   ;;  %s843_s18 = smov 8  }
  0x1e   : > { %666 = dma.hbm_to_vmem [thread:$0]  (!%p664_p13), %s1055_s4, 512, %s228_s15, [#allocation4], %s842_s17, %s842_s17, %s843_s18  }
  0x1f   : > { %253 = sbr.rel (%p941_p11) target bundleno = 904 (0x388), region = 44 }
  0x24   : > { %814 = dma.done.wait (%p671_p10), [#allocation4], 512  }
  0x25   : > { %816 = vsyncadd (%p671_p10), [#allocation4], 4294966784  ;;  %s279_s21 = sand.u32 1, %s831_s25   ;;  %p284_p2 = scmp.lt.s32.totalorder %s910_s28, 7 }
  0x26   : > { %s962_s22 = sshll.u32 %s279_s21, 3  ;;  %p1063_p6 = scmp.ne.s32.totalorder %s910_s28, 0 }
  0x27   : > { %s285_s23 = scalar_select %p284_p2, %s910_s28, 7 }
  0x28   : > { %s281_s14 = scalar_lea.vmem [#allocation6], %s962_s22  ;;  %291 = sbr.rel (%p1063_p6) target bundleno = 47 (0x2f), region = 52 }
  0x29   : > { %s603_s29 = sshll.u32 %s285_s23, 3 }
  0x2a   : > { %s968_s13 = scalar_lea.vmem %s1051_s0, %s603_s29 }
  0x2d   : > { %v292_v0 = vld [vmem:[%s1052_s1] sm:$0xff]  ;;  %vm293_vm0 = vcmask 261120  }
  0x2e   : > { %294 = vst.msk [vmem:[#allocation2] sm:$0xff] %vm293_vm0, %v292_v0 }
  0x2f PF: > { %v308_v2 = vld [vmem:[%s1053_s2 + $0x28] sm:$0xff]  ;;  %s844_s19 = smov 16   ;;  %v845_v3 = vmov 0.0   ;;  %v307_v4 = vld [vmem:[%s1053_s2 + $0x20] sm:$0xff]  ;;  %vm846_vm1 = vmmov 0   ;;  %v306_v5 = vld [vmem:[%s1053_s2 + $0x18] sm:$0xff] }
  0x30   : > { %627 = vmatprep.subr.mxu0 %v845_v3  ;;  %639 = vmatprep.mubr.msk.f32.mxu0 %vm846_vm1, %v845_v3  ;;  %v305_v6 = vld [vmem:[%s1053_s2 + $0x10] sm:$0xff]  ;;  %v304_v7 = vld [vmem:[%s1053_s2 + $0x8] sm:$0xff]  ;;  %v303_v8 = vld [vmem:[%s1053_s2] sm:$0xff]  ;;  %vm301_vm2 = vcmask 130048   ;;  %vm316_vm3 = vcmask 392192   ;;  %vm402_vm4 = vcmask 261120  }
  0x31   : > { %628 = vmatpush3.msra.mxu0 %v308_v2  ;;  %642 = vmatprep.subr.mxu1 %v845_v3  ;;  %v295_v9 = vld [vmem:[%s968_s13] sm:$0xff]  ;;  %v393_v13 = vld [vmem:[#allocation3 + $0x10] sm:$0xff]  ;;  %v392_v14 = vld [vmem:[#allocation3 + $0x8] sm:$0xff]  ;;  %s847_s8 = smov [#allocation7]   ;;  %p1064_p9 = scmp.eq.s32.totalorder %s910_s28, 7 }
  0x32   : > { %629 = vmatprep.subr.mxu0 %v845_v3  ;;  %650 = vmatprep.mubr.msk.f32.mxu1 %vm846_vm1, %v845_v3  ;;  %v394_v12 = vld [vmem:[#allocation3 + $0x18] sm:$0xff]  ;;  %v391_v15 = vld [vmem:[#allocation3] sm:$0xff]  ;;  %s514_s9 = sshll.u32 %s847_s8, 4  ;;  %s515_s9 = int_to_ptr.vmem [resolvable:$true] %s514_s9 }
  0x33   : > { %630 = vmatpush3.msra.mxu0 %v307_v4  ;;  %643 = vmatpush3.msra.mxu1 %v394_v12  ;;  %v605_v16 = vld [vmem:[%s1054_s3] ss:$0 sm:$0xff]  ;;  %s747_s15 = scalar_lea.vmem %s515_s9, 128  ;;  %p754_p12 = scmp.lt.s32.totalorder %s515_s9, %s515_s9 }
  0x34   : > { %631 = vmatprep.subr.mxu0 %v845_v3  ;;  %644 = vmatprep.subr.mxu1 %v845_v3  ;;  %v607_v21 = vld [vmem:[%s1056_s5] ss:$0 sm:$0xff]  ;;  %p748_p8 = scmp.ne.s32.totalorder %s515_s9, %s747_s15  ;;  %p755_p13 = scmp.lt.s32.totalorder %s747_s15, %s747_s15 }
  0x35   : > { %v296_v1 = vld [vmem:[#allocation2] sm:$0xff]  ;;  %632 = vmatpush3.msra.mxu0 %v306_v5  ;;  %645 = vmatpush3.msra.mxu1 %v393_v13 }
  0x36   : > { %298 = vrot.lane.b32.xlu0 %v296_v1, %s844_s19  ;;  %633 = vmatprep.subr.mxu0 %v845_v3  ;;  %p749_p10 = pnand %p748_p8, %p1064_p9  ;;  %p756_p0 = por %p755_p13, %p754_p12 }
  0x37   : > { %634 = vmatpush3.msra.mxu0 %v305_v6  ;;  %646 = vmatprep.subr.mxu1 %v845_v3 }
  0x38   : > { %635 = vmatprep.subr.mxu0 %v845_v3  ;;  %647 = vmatpush3.msra.mxu1 %v392_v14  ;;  %p750_p11 = pneg %p749_p10 }
  0x39   : > { %636 = vmatpush3.msra.mxu0 %v304_v7  ;;  %648 = vmatprep.subr.mxu1 %v845_v3 }
  0x3a   : > { %637 = vmatprep.subr.mxu0 %v845_v3  ;;  %649 = vmatpush3.msra.mxu1 %v391_v15  ;;  %p757_p1 = pnand %p756_p0, %p750_p11 }
  0x3b   : > { %638 = vmatpush3.msra.mxu0 %v303_v8 }
  0xa8   : > { %v299_v10 = vpop.permute.xlu0 %298 }
  0xa9   : > { %v302_v11 = vsel %vm301_vm2, %v295_v9, %v299_v10 }
  0xaa   : > { %640 = vmatmul.mubr.msk.f32.vlgmr.msra.gmra.mxu0 %vm316_vm3, %v302_v11 }
 0x16a   : > { %v386_v17 = vpop.f32.mrf.mxu0 }
 0x16b   : > { %v387_v18 = vadd.f32 %v605_v16, %v386_v17 }
 0x16c   : > { %v641_v19 = vpop.f32.mrf.mxu0 }
 0x16d   : > { %715 = vtanh.f32 %v387_v18 }
 0x17a   : > { %v716_v20 = vpop.eup %715 }
 0x17b   : > { %651 = vmatmul.mubr.msk.f32.vlgmr.msra.gmra.mxu1 %vm402_vm4, %v716_v20  ;;  %487 = vst.msk [vmem:[#allocation2] sm:$0xff] %vm402_vm4, %v716_v20  ;;  %488 = vst.msk [vmem:[#allocation7] sm:$0xff] %vm402_vm4, %v716_v20 }
 0x23b   : > { %v472_v22 = vpop.f32.mrf.mxu1 }
 0x23c   : > { %v473_v23 = vadd.f32 %v607_v21, %v472_v22 }
 0x23d   : > { %v652_v24 = vpop.f32.mrf.mxu1 }
 0x23e   : > { %476 = vmax.xlane.f32.xlu0 %v473_v23 }
 0x2c7   : > { %v477_v25 = vpop.xlane.xlu0 %476 }
 0x2c8   : > { %v478_v26 = vsub.f32 %v473_v23, %v477_v25 }
 0x2ca   : > { %v479_v27 = vmul.f32 1.442695, %v478_v26 }
 0x2cc   : > { %717 = vpow2.f32 %v479_v27 }
 0x2d9   : > { %v718_v28 = vpop.eup %717 }
 0x2da   : > { %481 = vadd.xlane.f32.xlu1 %v718_v28 }
 0x2db   : > { %760 = shalt.err (!%p757_p1)
}
 0x2dc   : > { %p1065_p3 = pmov %p1064_p9  ;;  %s610_s18 = sshll.u32 %s910_s28, 7 }
 0x2dd   : > { %s503_s19 = sshll.u32 %s281_s14, 4  ;;  %s501_s13 = scalar_lea.hbm %s1057_s6, %s610_s18  ;;  %s504_s19 = int_to_ptr.vmem [resolvable:$true] %s503_s19 }
 0x2de   : > { %659 = dma.vmem_to_hbm [thread:$0]  (%p1065_p3), %s515_s9, 128, %s1058_s7, [#allocation8]  }
 0x2df   : > { %s490_s29 = scalar_lea.sflag [#allocation5], %s279_s21  ;;  %s771_s8 = scalar_lea.vmem %s504_s19, 128 }
 0x2e0   : > { %p772_p4 = scmp.ne.s32.totalorder %s504_s19, %s771_s8  ;;  %s848_s9 = smov [#allocation6]  }
 0x2e1   : > { %s775_s15 = sshll.u32 %s848_s9, 4  ;;  %s776_s15 = int_to_ptr.vmem [resolvable:$false] %s775_s15 }
 0x2e2   : > { %p773_p7 = pnand %p772_p4, %p929_p5  ;;  %s777_s16 = scalar_lea.vmem %s776_s15, 256 }
 0x2e3   : > { %p778_p6 = scmp.lt.s32.totalorder %s504_s19, %s776_s15  ;;  %p779_p8 = scmp.lt.s32.totalorder %s777_s16, %s771_s8 }
 0x2e4   : > { %p774_p2 = pneg %p773_p7 }
 0x2e5   : > { %p780_p9 = por %p779_p8, %p778_p6 }
 0x2e7   : > { %p781_p10 = pnand %p780_p9, %p774_p2 }
 0x363   : > { %v482_v29 = vpop.xlane.xlu1 %481 }
 0x364   : > { %719 = vlog2.f32 %v482_v29 }
 0x371   : > { %v720_v30 = vpop.eup %719 }
 0x372   : > { %v484_v31 = vmul.f32 0.6931472, %v720_v30 }
 0x374   : > { %v485_v32 = vsub.f32 %v478_v26, %v484_v31 }
 0x376   : > { %486 = vst [vmem:[%s281_s14] sm:$0xff] %v485_v32 }
 0x377   : > { %784 = shalt.err (!%p781_p10)
}
 0x378   : > { %s785_s17 = scalar_lea.hbm %s501_s13, 128  ;;  %s789_s14 = scalar_lea.hbm %s1057_s6, 1024 }
 0x379   : > { %p786_p11 = scmp.ne.s32.totalorder %s501_s13, %s785_s17  ;;  %p790_p0 = scmp.lt.s32.totalorder %s501_s13, %s1057_s6 }
 0x37a   : > { %p791_p1 = scmp.lt.s32.totalorder %s789_s14, %s785_s17 }
 0x37b   : > { %p787_p12 = pnand %p786_p11, %p929_p5 }
 0x37c   : > { %p792_p3 = por %p791_p1, %p790_p0 }
 0x37d   : > { %p788_p13 = pneg %p787_p12 }
 0x37f   : > { %p793_p4 = pnand %p792_p3, %p788_p13 }
 0x381   : > { %796 = shalt.err (!%p793_p4)
}
 0x382   : > { %657 = dma.vmem_to_hbm [thread:$0]  (%p929_p5), %s504_s19, 128, %s501_s13, %s490_s29  }
 0x383   : > { %p1066_p7 = scmp.eq.s32.totalorder %s910_s28, 7 }
 0x385   : > { %818 = dma.done.wait (%p1066_p7), [#allocation8], 128   ;;  %p1067_p2 = pmov %p1066_p7 }
 0x387   : > { %820 = vsyncadd (%p1067_p2), [#allocation8], 4294967168 }
 0x388 PF: > { %p675_p6 = scmp.ge.s32.totalorder %s839_s27, 2  ;;  %s530_s23 = sand.u32 1, %s827_s24  }
 0x389   : > { %p1068_p8 = scmp.ne.s32.totalorder %s1061_s12, 0  ;;  %s531_s8 = scalar_lea.sflag [#allocation5], %s530_s23 }
 0x38b   : > { %p668_p9 = pnand %p675_p6, %p1068_p8 }
 0x38d   : > { %p669_p10 = pneg %p668_p9 }
 0x38f   : > { %822 = dma.done.wait (%p669_p10), %s531_s8, 128  }
 0x390   : > { %824 = vsyncadd (%p669_p10), %s531_s8, 4294967168  ;;  %p20_p5 = scmp.ge.s32.totalorder %s914_s30, 10   ;;  %s1069_s24 = smov %s831_s25 }
 0x391   : > { %s1070_s25 = smov %s835_s26  ;;  %s1071_s26 = smov %s925_s10 }
 0x392   : > { %s1072_s27 = smov %s914_s30  ;;  %22 = sbr.rel (!%p20_p5) target bundleno = 5 (0x5), region = 96 }
 0x397   :  { %536 = vsyncpa [#allocation4], 1 }
 0x398   :  { %538 = vsyncpa [#allocation4 + $0x1], 1 }
 0x399   :  { %539 = vsyncpa [#allocation5], 1 }
 0x39a   :  { %541 = vsyncpa [#allocation5 + $0x1], 1 }
 0x39b   :  { %542 = vsyncpa [#allocation8], 1 }

</bundles_post_ra>
